<compile_context>
chip_gen: v5e
topology: v5e:2x2
jax: 0.10.0
libtpu: 0.0.40
codegen_flags: <defaults>
</compile_context>

<pallas_src>
import functools

import numpy as np
import jax
import jax.numpy as jnp
from jax.experimental import pallas as pl
from jax.experimental.pallas import tpu as pltpu


_VMEM_LIMIT_BYTES = 48 * 1024 * 1024      # safe on v5e/v6e (128 MiB) and v7x (64 MiB)
_BLOCK_BUDGET_BYTES = 8 * 1024 * 1024     # per big block; x2 blocks x2 buffers ~= 32 MiB


# ----------------------------- Pallas kernels --------------------------------

def _sumsq_kernel(g_ref, ss_ref):
    """Pass 1: accumulate per-row sum of squares over spatial tiles.

    g_ref  : (rt, hw_t) native dtype
    ss_ref : (rt, 1)    f32 accumulator, resident across the hw ("arbitrary") axis
    """
    @pl.when(pl.program_id(1) == 0)
    def _init():
        ss_ref[...] = jnp.zeros_like(ss_ref)

    g = g_ref[...].astype(jnp.float32)           # upcast in-register only
    ss_ref[...] += jnp.sum(g * g, axis=-1, keepdims=True)


def _scale_from_sumsq_kernel(ss_ref, scale_ref, *, eps, num_channels):
    """Tiny per-(b, c) kernel: scale = C * safe_div(w, sum_c w), w = safe_div(1, norm).

    ss_ref / scale_ref: (B, C) f32, single block.
    """
    ss = ss_ref[...]
    norm = jnp.sqrt(ss)                                        # L2 over (H, W)
    weight = 1.0 / jnp.maximum(norm, eps)                      # safe_div(1, norm)
    wsum = jnp.sum(weight, axis=-1, keepdims=True)             # sum over channels
    scale_ref[...] = (float(num_channels) * weight) / jnp.maximum(wsum, eps)


def _apply_scale_kernel(scale_ref, g_ref, o_ref):
    """Pass 2: out = scale * g, streamed in native dtype.

    scale_ref: (rt, 1) f32;  g_ref / o_ref: (rt, hw_t) native dtype.
    """
    g = g_ref[...].astype(jnp.float32)
    o_ref[...] = (scale_ref[...] * g).astype(o_ref.dtype)


# ------------------------------ tile selection --------------------------------

def _largest_divisor_tile(extent, quantum, limit):
    """Largest t <= limit with t % quantum == 0 and extent % t == 0.

    Falls back to the full extent (a full-extent block is always layout-legal).
    """
    if extent <= limit:
        return extent
    t = (min(limit, extent) // quantum) * quantum
    while t >= quantum:
        if extent % t == 0:
            return t
        t -= quantum
    # TODO(synk): pad ragged extents instead of falling back to a full block.
    return extent


def _pick_row_hw_tiles(rows, hw, itemsize, block_budget_bytes=_BLOCK_BUDGET_BYTES):
    # Row tile: multiple of 8 (sublane-dense), modest so the hw tile can be wide.
    rt = _largest_divisor_tile(rows, 8, max(8, min(rows, 256)))
    # Keep >= 2 row tiles when possible so the leading "parallel" axis can feed
    # both TensorCores on v7x.
    if rt == rows and rows >= 16 and rows % 16 == 0:
        rt = rows // 2
    # Spatial tile: multiple of 128 (lane-dense), sized to the per-block budget.
    max_hw_elems = max(128, block_budget_bytes // max(rt * itemsize, 1))
    hw_t = _largest_divisor_tile(hw, 128, max_hw_elems)
    return rt, hw_t


# ------------------------------- wrappers -------------------------------------

def loss_scaler_forward(x):
    # LossScaleFunction.forward(x) == x : no kernel, no HBM traffic.
    assert x.ndim == 4, "LossScaler expects a 4-D (B, C, H, W) tensor"
    return x


def loss_scaler_backward(g, eps):
    B, C, H, W = g.shape
    rows, hw = B * C, H * W
    g2 = g.reshape(rows, hw)                      # sublane-dense 2-D layout
    rt, hw_t = _pick_row_hw_tiles(rows, hw, g2.dtype.itemsize)
    grid = (rows // rt, hw // hw_t)

    # Pass 1: per-row (= per (b, c)) sum of squares over spatial tiles.
    ss = pl.pallas_call(
        _sumsq_kernel,
        out_shape=jax.ShapeDtypeStruct((rows, 1), jnp.float32),
        grid=grid,
        in_specs=[pl.BlockSpec((rt, hw_t), lambda i, j: (i, j))],
        out_specs=pl.BlockSpec((rt, 1), lambda i, j: (i, 0)),
        compiler_params=pltpu.CompilerParams(
            dimension_semantics=("parallel", "arbitrary"),
            vmem_limit_bytes=_VMEM_LIMIT_BYTES),
    )(g2)

    # Tiny per-(b, c) scale (safe_div + channel L1 normalization) in one block.
    scale = pl.pallas_call(
        functools.partial(_scale_from_sumsq_kernel, eps=eps, num_channels=C),
        out_shape=jax.ShapeDtypeStruct((B, C), jnp.float32),
        grid=(1,),
        in_specs=[pl.BlockSpec((B, C), lambda i: (0, 0))],
        out_specs=pl.BlockSpec((B, C), lambda i: (0, 0)),
        compiler_params=pltpu.CompilerParams(
            dimension_semantics=("arbitrary",)),
    )(ss.reshape(B, C))

    # Pass 2: streamed scale * g in the gradient's native dtype.
    out2 = pl.pallas_call(
        _apply_scale_kernel,
        out_shape=jax.ShapeDtypeStruct((rows, hw), g.dtype),
        grid=grid,
        in_specs=[pl.BlockSpec((rt, 1), lambda i, j: (i, 0)),
                  pl.BlockSpec((rt, hw_t), lambda i, j: (i, j))],
        out_specs=pl.BlockSpec((rt, hw_t), lambda i, j: (i, j)),
        compiler_params=pltpu.CompilerParams(
            dimension_semantics=("parallel", "parallel"),
            vmem_limit_bytes=_VMEM_LIMIT_BYTES),
    )(scale.reshape(rows, 1), g2)

    return out2.reshape(B, C, H, W)


def make_loss_scaler(eps=1e-5):
    """Mirror of nn.Module LossScaler(eps): forward identity, custom backward."""

    @jax.custom_vjp
    def loss_scaler(x):
        return loss_scaler_forward(x)

    def _fwd(x):
        return loss_scaler_forward(x), None

    def _bwd(_, g):
        return (loss_scaler_backward(g, eps),)

    loss_scaler.defvjp(_fwd, _bwd)
    return loss_scaler


# ------------------------------ reference (JAX) -------------------------------

def reference_backward(g, eps):
    norm = jnp.sqrt(jnp.sum(g * g, axis=(-1, -2), keepdims=True))
    weight = 1.0 / jnp.maximum(norm, eps)
    l1w = weight / jnp.maximum(jnp.sum(weight, axis=1, keepdims=True), eps)
    return g.shape[1] * l1w * g


# ---------------------------------- main --------------------------------------

if __name__ == "__main__":
    B, C, H, W = 2, 4, 16, 16
    eps = 1e-5

    key = jax.random.PRNGKey(0)
    kx, kg = jax.random.split(key)
    x = jax.random.normal(kx, (B, C, H, W), jnp.float32)
    cotangent = jax.random.normal(kg, (B, C, H, W), jnp.float32)

    loss_scaler = make_loss_scaler(eps=eps)

    # Forward: identity (no kernel), must equal the input exactly.
    y = jax.block_until_ready(loss_scaler(x))
    np.testing.assert_allclose(np.asarray(y), np.asarray(x), rtol=0, atol=0)

    # Backward (Pallas kernels via jax.custom_vjp), f32 gradients.
    loss_fn = lambda t: jnp.sum(loss_scaler(t) * cotangent)
    dx = jax.block_until_ready(jax.grad(loss_fn)(x))
    dx_ref = reference_backward(cotangent, eps)
    np.testing.assert_allclose(np.asarray(dx), np.asarray(dx_ref),
                               rtol=1e-5, atol=1e-6)

    # Native-dtype path: bf16 gradients stay bf16 through HBM, f32 only in-register.
    g_bf16 = cotangent.astype(jnp.bfloat16)
    dx_bf16 = jax.block_until_ready(loss_scaler_backward(g_bf16, eps))
    ref_bf16 = reference_backward(g_bf16.astype(jnp.float32), eps)
    np.testing.assert_allclose(np.asarray(dx_bf16, dtype=np.float32),
                               np.asarray(ref_bf16), rtol=2e-2, atol=2e-2)

    print("KERNEL_OK")
</pallas_src>

<mosaic_0001>
module attributes {stable_mosaic.version = 11 : i64} {
  func.func @_sumsq_kernel(%arg0: i32, %arg1: i32, %arg2: memref<8x256xf32, #tpu.memory_space<vmem>>, %arg3: memref<8x1xf32, #tpu.memory_space<vmem>>) attributes {dimension_semantics = [#tpu.dimension_semantics<parallel>, #tpu.dimension_semantics<arbitrary>], iteration_bounds = array<i64: 1, 1>, scalar_prefetch = 0 : i64, scratch_operands = 0 : i64, tpu.core_type = #tpu.core_type<tc>, window_params = [{transform_indices = @transform_0, window_bounds = array<i64: 8, 256>}, {transform_indices = @transform_1, window_bounds = array<i64: 8, 1>}]} {
    %c0_i32 = arith.constant 0 : i32
    %0 = arith.cmpi eq, %arg1, %c0_i32 : i32
    %1 = arith.extui %0 : i1 to i32
    %c0_i32_0 = arith.constant 0 : i32
    %2 = arith.cmpi ne, %1, %c0_i32_0 : i32
    scf.if %2 {
      %cst_6 = arith.constant 0.000000e+00 : f32
      %10 = vector.broadcast %cst_6 : f32 to vector<8x1xf32>
      %c0_7 = arith.constant 0 : index
      %c0_8 = arith.constant 0 : index
      %11 = vector.load %arg3[%c0_7, %c0_8] : memref<8x1xf32, #tpu.memory_space<vmem>>, vector<8x1xf32>
      tpu.vector_store %arg3[%c0_7, %c0_8], %10 {strides = array<i32>} : memref<8x1xf32, #tpu.memory_space<vmem>>, vector<8x1xf32>,
    } else {
    }
    %c0 = arith.constant 0 : index
    %c0_1 = arith.constant 0 : index
    %3 = vector.load %arg2[%c0, %c0_1] : memref<8x256xf32, #tpu.memory_space<vmem>>, vector<8x256xf32>
    %c0_2 = arith.constant 0 : index
    %c0_3 = arith.constant 0 : index
    %4 = vector.load %arg3[%c0_2, %c0_3] : memref<8x1xf32, #tpu.memory_space<vmem>>, vector<8x1xf32>
    %5 = arith.mulf %3, %3 : vector<8x256xf32>
    %cst = arith.constant dense<0.000000e+00> : vector<8xf32>
    %6 = vector.multi_reduction <add>, %5, %cst [1] : vector<8x256xf32> to vector<8xf32>
    %7 = vector.shape_cast %6 : vector<8xf32> to vector<8x1xf32>
    %8 = arith.addf %4, %7 : vector<8x1xf32>
    %c0_4 = arith.constant 0 : index
    %c0_5 = arith.constant 0 : index
    %9 = vector.load %arg3[%c0_4, %c0_5] : memref<8x1xf32, #tpu.memory_space<vmem>>, vector<8x1xf32>
    tpu.vector_store %arg3[%c0_4, %c0_5], %8 {strides = array<i32>} : memref<8x1xf32, #tpu.memory_space<vmem>>, vector<8x1xf32>,
    return
  }
  func.func @transform_0(%arg0: i32, %arg1: i32) -> (i32, i32) {
    %c0_i32 = arith.constant 0 : i32
    return %arg0, %arg1 : i32, i32
  }
  func.func @transform_1(%arg0: i32, %arg1: i32) -> (i32, i32) {
    %c0_i32 = arith.constant 0 : i32
    %c0_i32_0 = arith.constant 0 : i32
    return %arg0, %c0_i32 : i32, i32
  }
}

</mosaic_0001>

<bundles_post_ra>
// kernel: tpu_custom_call.1
= control target key start
LH: loop header
LB: loop body
LE: loop exit
PB: predicated region body
PF: predicated region fallthrough
CT: control target
= control target key end

     0   :  { %6 = vsyncpa [#allocation3], 0  ;;  %s72_s9 = smov [#allocation2]   ;;  %s96_s0 = inlined_call_operand.hbm [shape: f32[8,256], index: 0, kind: input, shape index: {}]   ;;  %s97_s1 = inlined_call_operand.vmem [shape: f32[8,1], index: 1, kind: output, shape index: {}]  }
   0x1   :  { %s12_s8 = sshll.u32 %s96_s0, 4  ;;  %s14_s10 = sshll.u32 %s72_s9, 4  ;;  %s13_s8 = int_to_ptr.hbm [resolvable:$true] %s12_s8  ;;  %s15_s10 = int_to_ptr.vmem [resolvable:$true] %s14_s10 }
   0x2   :  { %17 = dma.hbm_to_vmem [thread:$0]  %s13_s8, 256, %s15_s10, [#allocation3]  }
   0x3   :  { %70 = dma.done.wait [#allocation3], 256  }
   0x4   :  { %71 = vsyncadd [#allocation3], 4294967040  ;;  %vm26_vm0 = vcmask 7168   ;;  %v73_v0 = vmov 0.0   ;;  %v28_v1 = vld [vmem:[#allocation2] sm:$0xff]  ;;  %v29_v2 = vld [vmem:[#allocation2 + $0x8] sm:$0xff] }
   0x5   :  { %27 = vst.msk [vmem:[%s97_s1] sm:$0xff] %vm26_vm0, %v73_v0  ;;  %v31_v3 = vmul.f32 %v28_v1, %v28_v1  ;;  %v32_v4 = vmul.f32 %v29_v2, %v29_v2 }
   0x7   :  { %v33_v5 = vadd.f32 %v32_v4, %v31_v3 }
   0x9   :  { %34 = vadd.xlane.f32.xlu0 %v33_v5 }
   0xc   :  { %v30_v6 = vld [vmem:[%s97_s1] sm:$0xff] }
  0x7c   :  { %v35_v7 = vpop.xlane.xlu0 %34 }
  0x7d   :  { %v36_v8 = vadd.f32 %v35_v7, %v30_v6 }
  0x7f   :  { %38 = vst.msk [vmem:[%s97_s1] sm:$0xff] %vm26_vm0, %v36_v8 }
  0x80   :  { %43 = vsyncpa [#allocation3], 1 }

</bundles_post_ra>
